<compile_context>
chip_gen: v7x
topology: tpu7x:2x2x1
jax: 0.10.0
libtpu: 0.0.40
codegen_flags: <defaults>
</compile_context>

<pallas_src>
import functools

import jax
import jax.numpy as jnp
import numpy as np
from jax.experimental import pallas as pl
from jax.experimental.pallas import tpu as pltpu


def _cbam_kernel(x_ref, w1t_ref, w2t_ref, conv_ref, o_ref, *, true_hw):
    """One grid step: Bt batch elements on a lane-dense (Bt, C, HWp) slab.

    x_ref / o_ref : (Bt, C, HWp)
    w1t_ref       : (C, Cr)      fc1 (1x1 conv) weight, transposed
    w2t_ref       : (Cr, C)      fc2 (1x1 conv) weight, transposed
    conv_ref      : (2*HWp, HWp) 7x7 spatial conv expressed as a dense matrix
    """
    x = x_ref[...].astype(jnp.float32)                 # (Bt, C, HWp)
    bt, _, hwp = x.shape

    # ---------------- Channel attention ------------------------------------
    # avg / max pool over spatial positions (lane reduce).
    avg_c = jnp.sum(x, axis=2) * (1.0 / true_hw)       # (Bt, C)
    if hwp != true_hw:                                  # mask zero padding for max
        lane = jax.lax.broadcasted_iota(jnp.int32, x.shape, 2)
        x_mx = jnp.where(lane < true_hw, x, -jnp.inf)
    else:
        x_mx = x
    max_c = jnp.max(x_mx, axis=2)                       # (Bt, C)

    # Shared MLP on stacked [avg ; max] -> a single amortized MXU pass.
    pooled = jnp.concatenate([avg_c, max_c], axis=0)    # (2*Bt, C)
    h = jnp.maximum(
        jnp.dot(pooled, w1t_ref[...], preferred_element_type=jnp.float32), 0.0)
    out2 = jnp.dot(h, w2t_ref[...], preferred_element_type=jnp.float32)  # (2*Bt, C)
    ca = jax.nn.sigmoid(out2[:bt] + out2[bt:])          # (Bt, C)

    x_ca = x * ca[:, :, None]                           # (Bt, C, HWp)

    # ---------------- Spatial attention -------------------------------------
    avg_s = jnp.mean(x_ca, axis=1)                      # (Bt, HWp)  sublane reduce
    max_s = jnp.max(x_ca, axis=1)                       # (Bt, HWp)
    stats = jnp.concatenate([avg_s, max_s], axis=1)     # (Bt, 2*HWp) lane concat
    # 7x7 conv as one dense matmul on the (otherwise idle) MXU — no XLU tap
    # loop, no (HW) <-> (H, W) relayouts.
    logits = jnp.dot(stats, conv_ref[...], preferred_element_type=jnp.float32)
    sa = jax.nn.sigmoid(logits)                         # (Bt, HWp)

    # Single fused, lane-dense store.
    o_ref[...] = (x_ca * sa[:, None, :]).astype(o_ref.dtype)


def _conv_as_matmul(w_spatial, H, W, hwp, ksize):
    """Dense (2*hwp, hwp) matrix M with conv([avg|max])[o] = sum_i stats[i] M[i, o].

    Rows [0, H*W)         : avg-map input pixels.
    Rows [hwp, hwp + H*W) : max-map input pixels.
    Padded rows / columns are zero, so lane padding is inert.
    """
    pad = (ksize - 1) // 2
    w = np.asarray(w_spatial, np.float32).reshape(2, ksize, ksize)
    mat = np.zeros((2 * hwp, hwp), np.float32)
    yo = np.arange(H)[:, None]
    xo = np.arange(W)[None, :]
    o_idx = (yo * W + xo).reshape(-1)
    for dy in range(ksize):
        for dx in range(ksize):
            yi = yo + dy - pad
            xi = xo + dx - pad
            valid = ((yi >= 0) & (yi < H) & (xi >= 0) & (xi < W)).reshape(-1)
            i_idx = (np.clip(yi, 0, H - 1) * W + np.clip(xi, 0, W - 1)).reshape(-1)
            mat[i_idx[valid], o_idx[valid]] = w[0, dy, dx]
            mat[hwp + i_idx[valid], o_idx[valid]] = w[1, dy, dx]
    return jnp.asarray(mat)


def _pick_batch_tile(B, per_batch_bytes, budget_bytes=2 << 20):
    bt = int(min(B, max(1, budget_bytes // max(per_batch_bytes, 1))))
    while B % bt:
        bt -= 1
    return bt


def cbam_block(x, w1, w2, w_spatial, *, kernel_size=7):
    """x: (B, C, H, W). w1: (C//r, C), w2: (C, C//r), w_spatial: (1, 2, k, k)."""
    B, C, H, W = x.shape
    Cr = w1.shape[0]
    HW = H * W
    HWp = max(128, ((HW + 127) // 128) * 128)           # lane-density guard

    x2 = x.reshape(B, C, HW)
    if HWp != HW:
        x2 = jnp.pad(x2, ((0, 0), (0, 0), (0, HWp - HW)))

    w1t = w1.astype(jnp.float32).T                      # (C, Cr)
    w2t = w2.astype(jnp.float32).T                      # (Cr, C)
    conv_mat = _conv_as_matmul(w_spatial, H, W, HWp, kernel_size)  # (2*HWp, HWp)

    Bt = _pick_batch_tile(B, C * HWp * 4)
    grid = (B // Bt,)

    # in+out x-blocks (double-buffered) + resident weights, with headroom.
    vmem_bytes = 4 * Bt * C * HWp * 4 + 2 * 2 * HWp * HWp * 4 + (1 << 20)
    vmem_limit = int(min(max(vmem_bytes, 32 << 20), 64 << 20))

    kernel = functools.partial(_cbam_kernel, true_hw=HW)
    out = pl.pallas_call(
        kernel,
        out_shape=jax.ShapeDtypeStruct((B, C, HWp), x.dtype),
        grid=grid,
        in_specs=[
            pl.BlockSpec((Bt, C, HWp), lambda b: (b, 0, 0)),
            pl.BlockSpec((C, Cr), lambda b: (0, 0)),
            pl.BlockSpec((Cr, C), lambda b: (0, 0)),
            pl.BlockSpec((2 * HWp, HWp), lambda b: (0, 0)),
        ],
        out_specs=pl.BlockSpec((Bt, C, HWp), lambda b: (b, 0, 0)),
        compiler_params=pltpu.CompilerParams(
            dimension_semantics=("parallel",),
            vmem_limit_bytes=vmem_limit),
    )(x2, w1t, w2t, conv_mat)

    return out[:, :, :HW].reshape(B, C, H, W)


def cbam_reference(x, w1, w2, w_spatial):
    """Pure-JAX reference mirroring the PyTorch module (for validation)."""
    # channel attention
    avg = jnp.mean(x, axis=(2, 3))
    mx = jnp.max(x, axis=(2, 3))

    def mlp(v):
        h = jax.nn.relu(v @ w1.T)
        return h @ w2.T

    ca = jax.nn.sigmoid(mlp(avg) + mlp(mx))[:, :, None, None]
    x = x * ca
    # spatial attention
    avg_s = jnp.mean(x, axis=1, keepdims=True)
    max_s = jnp.max(x, axis=1, keepdims=True)
    s = jnp.concatenate([avg_s, max_s], axis=1)
    conv = jax.lax.conv_general_dilated(
        s, w_spatial, window_strides=(1, 1), padding=[(3, 3), (3, 3)],
        dimension_numbers=("NCHW", "OIHW", "NCHW"))
    sa = jax.nn.sigmoid(conv)
    return x * sa


if __name__ == "__main__":
    B, C, H, W = 2, 16, 16, 16
    ratio, ksize = 8, 7
    Cr = C // ratio

    key = jax.random.PRNGKey(0)
    kx, k1, k2, k3 = jax.random.split(key, 4)
    x = jax.random.normal(kx, (B, C, H, W), dtype=jnp.float32)
    # deterministic synthetic weights (shapes match nn.Conv2d weights, squeezed)
    w1 = jax.random.normal(k1, (Cr, C), dtype=jnp.float32) * 0.2   # fc1: (C//r, C, 1, 1)
    w2 = jax.random.normal(k2, (C, Cr), dtype=jnp.float32) * 0.2   # fc2: (C, C//r, 1, 1)
    w_spatial = jax.random.normal(k3, (1, 2, ksize, ksize), dtype=jnp.float32) * 0.1

    out = cbam_block(x, w1, w2, w_spatial, kernel_size=ksize)
    out = jax.block_until_ready(out)

    ref = cbam_reference(x, w1, w2, w_spatial)
    # Tolerance accounts for MXU f32 matmul pass precision (conv is now a
    # 2*HWp-long MXU contraction instead of exact-f32 VPU accumulation).
    np.testing.assert_allclose(np.asarray(out), np.asarray(ref),
                               rtol=2e-3, atol=2e-3)
    print("KERNEL_OK")
</pallas_src>

<mosaic_0001>
module attributes {stable_mosaic.version = 11 : i64} {
  func.func @_cbam_kernel(%arg0: i32, %arg1: memref<2x16x256xf32, #tpu.memory_space<vmem>>, %arg2: memref<16x2xf32, #tpu.memory_space<vmem>>, %arg3: memref<2x16xf32, #tpu.memory_space<vmem>>, %arg4: memref<512x256xf32, #tpu.memory_space<vmem>>, %arg5: memref<2x16x256xf32, #tpu.memory_space<vmem>>) attributes {dimension_semantics = [#tpu.dimension_semantics<parallel>], iteration_bounds = array<i64: 1>, scalar_prefetch = 0 : i64, scratch_operands = 0 : i64, tpu.core_type = #tpu.core_type<tc>, window_params = [{transform_indices = @transform_0, window_bounds = array<i64: 2, 16, 256>}, {pipeline_mode = #tpu.pipeline_mode<synchronous>, transform_indices = @transform_1, window_bounds = array<i64: 16, 2>}, {pipeline_mode = #tpu.pipeline_mode<synchronous>, transform_indices = @transform_2, window_bounds = array<i64: 2, 16>}, {pipeline_mode = #tpu.pipeline_mode<synchronous>, transform_indices = @transform_3, window_bounds = array<i64: 512, 256>}, {transform_indices = @transform_4, window_bounds = array<i64: 2, 16, 256>}]} {
    %c0 = arith.constant 0 : index
    %c0_0 = arith.constant 0 : index
    %c0_1 = arith.constant 0 : index
    %0 = vector.load %arg1[%c0, %c0_0, %c0_1] : memref<2x16x256xf32, #tpu.memory_space<vmem>>, vector<2x16x256xf32>
    %cst = arith.constant dense<0.000000e+00> : vector<2x16xf32>
    %1 = vector.multi_reduction <add>, %0, %cst [2] : vector<2x16x256xf32> to vector<2x16xf32>
    %cst_2 = arith.constant 3.906250e-03 : f32
    %2 = vector.broadcast %cst_2 : f32 to vector<2x16xf32>
    %3 = arith.mulf %1, %2 : vector<2x16xf32>
    %cst_3 = arith.constant dense<0xFF800000> : vector<2x16xf32>
    %4 = vector.multi_reduction <maximumf>, %0, %cst_3 [2] : vector<2x16x256xf32> to vector<2x16xf32>
    %5 = tpu.concatenate %3, %4 in 0 : vector<2x16xf32>, vector<2x16xf32> -> vector<4x16xf32>
    %c0_4 = arith.constant 0 : index
    %c0_5 = arith.constant 0 : index
    %6 = vector.load %arg2[%c0_4, %c0_5] : memref<16x2xf32, #tpu.memory_space<vmem>>, vector<16x2xf32>
    %cst_6 = arith.constant dense<0.000000e+00> : vector<4x2xf32>
    %7 = tpu.matmul %5, %6, %cst_6 {dimension_numbers = #tpu.dot_dimension_numbers<[1], [0], [0], [1], [0, 0, 1, 1], [], []>} : vector<4x16xf32>, vector<16x2xf32>, vector<4x2xf32> -> vector<4x2xf32>
    %cst_7 = arith.constant 0.000000e+00 : f32
    %8 = vector.broadcast %cst_7 : f32 to vector<4x2xf32>
    %9 = arith.maximumf %7, %8 : vector<4x2xf32>
    %c0_8 = arith.constant 0 : index
    %c0_9 = arith.constant 0 : index
    %10 = vector.load %arg3[%c0_8, %c0_9] : memref<2x16xf32, #tpu.memory_space<vmem>>, vector<2x16xf32>
    %cst_10 = arith.constant dense<0.000000e+00> : vector<4x16xf32>
    %11 = tpu.matmul %9, %10, %cst_10 {dimension_numbers = #tpu.dot_dimension_numbers<[1], [0], [0], [1], [0, 0, 1, 1], [], []>} : vector<4x2xf32>, vector<2x16xf32>, vector<4x16xf32> -> vector<4x16xf32>
    %12 = vector.extract_strided_slice %11 {offsets = [0, 0], sizes = [2, 16], strides = [1, 1]} : vector<4x16xf32> to vector<2x16xf32>
    %13 = vector.extract_strided_slice %11 {offsets = [2, 0], sizes = [2, 16], strides = [1, 1]} : vector<4x16xf32> to vector<2x16xf32>
    %14 = arith.addf %12, %13 : vector<2x16xf32>
    %15 = arith.negf %14 : vector<2x16xf32>
    %16 = math.exp %15 : vector<2x16xf32>
    %cst_11 = arith.constant 1.000000e+00 : f32
    %17 = vector.broadcast %cst_11 : f32 to vector<2x16xf32>
    %18 = arith.addf %17, %16 : vector<2x16xf32>
    %19 = arith.divf %17, %18 : vector<2x16xf32>
    %20 = vector.shape_cast %19 : vector<2x16xf32> to vector<2x16x1xf32>
    %21 = vector.broadcast %20 : vector<2x16x1xf32> to vector<2x16x256xf32>
    %22 = arith.mulf %0, %21 : vector<2x16x256xf32>
    %cst_12 = arith.constant dense<0.000000e+00> : vector<2x256xf32>
    %23 = vector.multi_reduction <add>, %22, %cst_12 [1] : vector<2x16x256xf32> to vector<2x256xf32>
    %cst_13 = arith.constant 1.600000e+01 : f32
    %24 = vector.broadcast %cst_13 : f32 to vector<2x256xf32>
    %25 = arith.divf %23, %24 : vector<2x256xf32>
    %cst_14 = arith.constant dense<0xFF800000> : vector<2x256xf32>
    %26 = vector.multi_reduction <maximumf>, %22, %cst_14 [1] : vector<2x16x256xf32> to vector<2x256xf32>
    %27 = tpu.concatenate %25, %26 in 1 : vector<2x256xf32>, vector<2x256xf32> -> vector<2x512xf32>
    %c0_15 = arith.constant 0 : index
    %c0_16 = arith.constant 0 : index
    %28 = vector.load %arg4[%c0_15, %c0_16] : memref<512x256xf32, #tpu.memory_space<vmem>>, vector<512x256xf32>
    %cst_17 = arith.constant dense<0.000000e+00> : vector<2x256xf32>
    %29 = tpu.matmul %27, %28, %cst_17 {dimension_numbers = #tpu.dot_dimension_numbers<[1], [0], [0], [1], [0, 0, 1, 1], [], []>} : vector<2x512xf32>, vector<512x256xf32>, vector<2x256xf32> -> vector<2x256xf32>
    %30 = arith.negf %29 : vector<2x256xf32>
    %31 = math.exp %30 : vector<2x256xf32>
    %cst_18 = arith.constant 1.000000e+00 : f32
    %32 = vector.broadcast %cst_18 : f32 to vector<2x256xf32>
    %33 = arith.addf %32, %31 : vector<2x256xf32>
    %34 = arith.divf %32, %33 : vector<2x256xf32>
    %35 = vector.shape_cast %34 : vector<2x256xf32> to vector<2x1x256xf32>
    %36 = vector.broadcast %35 : vector<2x1x256xf32> to vector<2x16x256xf32>
    %37 = arith.mulf %22, %36 : vector<2x16x256xf32>
    %c0_19 = arith.constant 0 : index
    %c0_20 = arith.constant 0 : index
    %c0_21 = arith.constant 0 : index
    %38 = vector.load %arg5[%c0_19, %c0_20, %c0_21] : memref<2x16x256xf32, #tpu.memory_space<vmem>>, vector<2x16x256xf32>
    tpu.vector_store %arg5[%c0_19, %c0_20, %c0_21], %37 {strides = array<i32>} : memref<2x16x256xf32, #tpu.memory_space<vmem>>, vector<2x16x256xf32>,
    return
  }
  func.func @transform_0(%arg0: i32) -> (i32, i32, i32) {
    %c0_i32 = arith.constant 0 : i32
    %c0_i32_0 = arith.constant 0 : i32
    %c0_i32_1 = arith.constant 0 : i32
    return %arg0, %c0_i32, %c0_i32_0 : i32, i32, i32
  }
  func.func @transform_1(%arg0: i32) -> (i32, i32) {
    %c0_i32 = arith.constant 0 : i32
    %c0_i32_0 = arith.constant 0 : i32
    %c0_i32_1 = arith.constant 0 : i32
    return %c0_i32, %c0_i32_0 : i32, i32
  }
  func.func @transform_2(%arg0: i32) -> (i32, i32) {
    %c0_i32 = arith.constant 0 : i32
    %c0_i32_0 = arith.constant 0 : i32
    %c0_i32_1 = arith.constant 0 : i32
    return %c0_i32, %c0_i32_0 : i32, i32
  }
  func.func @transform_3(%arg0: i32) -> (i32, i32) {
    %c0_i32 = arith.constant 0 : i32
    %c0_i32_0 = arith.constant 0 : i32
    %c0_i32_1 = arith.constant 0 : i32
    return %c0_i32, %c0_i32_0 : i32, i32
  }
  func.func @transform_4(%arg0: i32) -> (i32, i32, i32) {
    %c0_i32 = arith.constant 0 : i32
    %c0_i32_0 = arith.constant 0 : i32
    %c0_i32_1 = arith.constant 0 : i32
    return %arg0, %c0_i32, %c0_i32_0 : i32, i32, i32
  }
}

</mosaic_0001>

<bundles_post_ra>
// kernel: tpu_custom_call.1
= control target key start
LH: loop header
LB: loop body
LE: loop exit
PB: predicated region body
PF: predicated region fallthrough
CT: control target
= control target key end

     0   :  { %9 = vsyncpa [#allocation3], 0  ;;  %s1210_s0 = inlined_call_operand.hbm [shape: f32[2,16,256], index: 0, kind: input, shape index: {}]   ;;  %s1211_s1 = inlined_call_operand.vmem [shape: f32[16,2], index: 1, kind: input, shape index: {}]   ;;  %s1212_s2 = inlined_call_operand.vmem [shape: f32[2,16], index: 2, kind: input, shape index: {}]   ;;  %s1213_s3 = inlined_call_operand.hbm [shape: f32[512,256], index: 3, kind: input, shape index: {}]   ;;  %s1214_s4 = inlined_call_operand.hbm [shape: f32[2,16,256], index: 4, kind: output, shape index: {}]  }
   0x1   :  { %10 = vsyncpa [#allocation6], 0 }
   0x2   :  { %11 = vsyncpa [#allocation4], 0  ;;  %s1020_s15 = smov [#allocation2]   ;;  %s948_s19 = scalar_lea.hbm %s1210_s0, 1024 }
   0x3   :  { %s17_s16 = sshll.u32 %s1020_s15, 4  ;;  %p949_p0 = scmp.ne.s32.totalorder %s1210_s0, %s948_s19  ;;  %s18_s16 = int_to_ptr.vmem [resolvable:$true] %s17_s16 }
   0x4   :  { %p952_p1 = scmp.lt.u32.totalorder %s948_s19, %s1210_s0 }
   0x6   :  { %p954_p2 = pnand %p952_p1, %p949_p0 }
   0x8   :  { %957 = shalt.err (!%p954_p2)
}
   0x9   :  { %s958_s24 = scalar_lea.vmem %s18_s16, 1024  ;;  %p963_p4 = scmp.lt.s32.totalorder %s18_s16, %s18_s16 }
   0xa   :  { %p959_p3 = scmp.ne.s32.totalorder %s18_s16, %s958_s24  ;;  %p964_p5 = scmp.lt.s32.totalorder %s958_s24, %s958_s24 }
   0xc   :  { %p965_p6 = por %p964_p5, %p963_p4 }
   0xe   :  { %p966_p7 = pnand %p965_p6, %p959_p3 }
  0x10   :  { %969 = shalt.err (!%p966_p7)
}
  0x11   :  { %s1021_s25 = smov 256   ;;  %s1022_s26 = smov 16  }
  0x12   :  { %23 = dma.hbm_to_vmem [thread:$0]  %s1210_s0, 1024, %s18_s16, [#allocation3], %s1021_s25, %s1021_s25, %s1022_s26  }
  0x13   :  { %s1023_s29 = smov [#allocation5]   ;;  %s970_s7 = scalar_lea.hbm %s1213_s3, 16384 }
  0x14   :  { %s33_s30 = sshll.u32 %s1023_s29, 4  ;;  %p971_p8 = scmp.ne.s32.totalorder %s1213_s3, %s970_s7  ;;  %s34_s30 = int_to_ptr.vmem [resolvable:$true] %s33_s30 }
  0x15   :  { %p974_p9 = scmp.lt.u32.totalorder %s970_s7, %s1213_s3 }
  0x17   :  { %p976_p10 = pnand %p974_p9, %p971_p8 }
  0x19   :  { %979 = shalt.err (!%p976_p10)
}
  0x1a   :  { %s980_s12 = scalar_lea.vmem %s34_s30, 16384  ;;  %p985_p12 = scmp.lt.s32.totalorder %s34_s30, %s34_s30 }
  0x1b   :  { %p981_p11 = scmp.ne.s32.totalorder %s34_s30, %s980_s12  ;;  %p986_p13 = scmp.lt.s32.totalorder %s980_s12, %s980_s12 }
  0x1d   :  { %p987_p0 = por %p986_p13, %p985_p12 }
  0x1f   :  { %p988_p1 = pnand %p987_p0, %p981_p11 }
  0x21   :  { %991 = shalt.err (!%p988_p1)
}
  0x22   :  { %39 = dma.hbm_to_vmem [thread:$0]  %s1213_s3, 16384, %s34_s30, [#allocation6], %s1021_s25, %s1021_s25, %s1022_s26  }
  0x23   :  { %1014 = dma.done.wait [#allocation3], 1024  }
  0x24   :  { %1015 = vsyncadd [#allocation3], 4294966272 }
  0x25   :  { %1016 = dma.done.wait [#allocation6], 16384  }
  0x26   :  { %1017 = vsyncadd [#allocation6], 4294950912  ;;  %v1084_v0 = vld [vmem:[#allocation2 + $0x20] sm:$0xff]  ;;  %v1086_v1 = vld [vmem:[#allocation2 + $0x28] sm:$0xff]  ;;  %v1024_v19 = vmov 0.0|0.0   ;;  %vm1025_vm0 = vmmov 0   ;;  %v86_v21 = vlaneseq }
  0x27   :  { %v1088_v2 = vld [vmem:[#allocation2] sm:$0xff]  ;;  %v60_v3 = vadd.f32 %v1086_v1, %v1084_v0  ;;  %v1092_v4 = vld [vmem:[#allocation2 + $0x8] sm:$0xff]  ;;  %v1094_v5 = vld [vmem:[#allocation2 + $0x30] sm:$0xff]  ;;  %v76_v15 = vmax.f32 %v1084_v0, %v1086_v1  ;;  %794 = vmatprep.subr.bf16.mxu0 %v1024_v19  ;;  %v1026_v20 = vmov 0.0   ;;  %vm97_vm1 = vcmask 130112  }
  0x28   :  { %v1096_v6 = vld [vmem:[#allocation2 + $0x38] sm:$0xff]  ;;  %v54_v7 = vadd.f32 %v1092_v4, %v1088_v2  ;;  %v1100_v8 = vld [vmem:[#allocation2 + $0x10] sm:$0xff]  ;;  %v70_v13 = vmax.f32 %v1088_v2, %v1092_v4  ;;  %v138_v16 = vld [vmem:[%s1211_s1] sm:$0xff]  ;;  %786 = vmatprep.mubr.msk.f32.mxu0 %vm1025_vm0, %v1026_v20  ;;  %789 = vmatprep.subr.mxu1 %v1026_v20  ;;  %v87_v22 = vand.u32 127, %v86_v21  ;;  %v1122_v26 = vshrl.u32 %v86_v21, 7 }
  0x29   :  { %v1102_v9 = vld [vmem:[#allocation2 + $0x18] sm:$0xff]  ;;  %61 = vadd.xlane.f32.xlu1 %v60_v3  ;;  %v63_v10 = vadd.f32 %v1096_v6, %v1094_v5  ;;  %v79_v14 = vmax.f32 %v1094_v5, %v1096_v6  ;;  %v139_v17 = vld [vmem:[%s1211_s1 + $0x8] sm:$0xff]  ;;  %791 = vmatprep.mubr.msk.f32.mxu1 %vm1025_vm0, %v1026_v20  ;;  %vm108_vm2 = vcmask 1041409   ;;  %vm133_vm3 = vcmask 1043459   ;;  %v215_v54 = vld [vmem:[%s1212_s2] sm:$0x3] }
  0x2a   :  { %55 = vadd.xlane.f32.xlu0 %v54_v7  ;;  %v57_v11 = vadd.f32 %v1102_v9, %v1100_v8  ;;  %v73_v12 = vmax.f32 %v1100_v8, %v1102_v9  ;;  %v795_v18 = vpack.c.bf16 %v139_v17, %v138_v16  ;;  %v92_v25 = vadd.s32 4294967288, %v87_v22  ;;  %v475_v58 = vld [vmem:[#allocation5 + $0x208] sm:$0xff]  ;;  %v477_v59 = vld [vmem:[#allocation5 + $0x218] sm:$0xff]  ;;  %v474_v60 = vld [vmem:[#allocation5 + $0x200] sm:$0xff]  ;;  %s1028_s2 = smov [#allocation7]  }
  0x2b   :  { %v90_v32 = vsub.s32 %v87_v22, %v1122_v26  ;;  %vm136_vm4 = vcmask 1041408   ;;  %vm140_vm5 = vcmask 130048   ;;  %vm216_vm6 = vcmask 15360   ;;  %v476_v62 = vld [vmem:[#allocation5 + $0x210] sm:$0xff]  ;;  %v411_v63 = vld [vmem:[#allocation5 + $0x8] sm:$0xff]  ;;  %v413_v3 = vld [vmem:[#allocation5 + $0x18] sm:$0xff] }
  0x2c   :  { %796 = vmatpush3.bf16.msra.mxu0 %v795_v18  ;;  %v95_v29 = vsub.s32 %v92_v25, %v1122_v26  ;;  %790 = vmatpush3.msk.msra.mxu1 %vm136_vm4, %v215_v54  ;;  %v861_v61 = vpack.c.bf16 %v477_v59, %v475_v58  ;;  %v863_v7 = vpack.c.bf16 %v476_v62, %v474_v60  ;;  %v478_v16 = vld [vmem:[#allocation5 + $0x220] sm:$0xff]  ;;  %v480_v17 = vld [vmem:[#allocation5 + $0x230] sm:$0xff]  ;;  %v415_v20 = vld [vmem:[#allocation5 + $0x28] sm:$0xff]  ;;  %s758_s18 = sshll.u32 %s1028_s2, 4  ;;  %s759_s18 = int_to_ptr.vmem [resolvable:$true] %s758_s18 }
  0x2d   :  { %64 = vadd.xlane.f32.xlu1 %v63_v10  ;;  %v797_v10 = vpack.c.bf16 %v413_v3, %v411_v63  ;;  %v867_v19 = vpack.c.bf16 %v480_v17, %v478_v16  ;;  %v417_v21 = vld [vmem:[#allocation5 + $0x38] sm:$0xff]  ;;  %v414_v22 = vld [vmem:[#allocation5 + $0x20] sm:$0xff]  ;;  %v483_v25 = vld [vmem:[#allocation5 + $0x248] sm:$0xff]  ;;  %s992_s19 = scalar_lea.vmem %s759_s18, 1024  ;;  %p997_p3 = scmp.lt.s32.totalorder %s759_s18, %s759_s18 }
  0x2e   :  { %58 = vadd.xlane.f32.xlu0 %v57_v11  ;;  %v410_v11 = vld [vmem:[#allocation5] sm:$0xff]  ;;  %862 = vmatprep.subr.bf16.mxu1 %v861_v61  ;;  %v428_v60 = vld [vmem:[#allocation5 + $0x90] sm:$0xff]  ;;  %v495_v61 = vld [vmem:[#allocation5 + $0x2a8] sm:$0xff]  ;;  %p993_p2 = scmp.ne.s32.totalorder %s759_s18, %s992_s19  ;;  %p998_p4 = scmp.lt.s32.totalorder %s992_s19, %s992_s19 }
  0x2f   :  { %798 = vmatprep.subr.bf16.mxu0 %v797_v10  ;;  %v426_v58 = vld [vmem:[#allocation5 + $0x80] sm:$0xff]  ;;  %v497_v62 = vld [vmem:[#allocation5 + $0x2b8] sm:$0xff]  ;;  %v431_v63 = vld [vmem:[#allocation5 + $0xa8] sm:$0xff] }
  0x30   :  { %v433_v3 = vld [vmem:[#allocation5 + $0xb8] sm:$0xff]  ;;  %v815_v10 = vpack.c.bf16 %v428_v60, %v426_v58  ;;  %v432_v16 = vld [vmem:[#allocation5 + $0xb0] sm:$0xff]  ;;  %v499_v17 = vld [vmem:[#allocation5 + $0x2c8] sm:$0xff]  ;;  %p999_p5 = por %p998_p4, %p997_p3 }
  0x31   :  { %74 = vmax.xlane.f32.xlu1 %v73_v12  ;;  %v412_v12 = vld [vmem:[#allocation5 + $0x10] sm:$0xff] }
  0x32   :  { %71 = vmax.xlane.f32.xlu0 %v70_v13  ;;  %v479_v13 = vld [vmem:[#allocation5 + $0x228] sm:$0xff]  ;;  %v512_v60 = vld [vmem:[#allocation5 + $0x330] sm:$0xff]  ;;  %p1000_p6 = pnand %p999_p5, %p993_p2 }
  0x35   :  { %80 = vmax.xlane.f32.xlu1 %v79_v14  ;;  %v799_v14 = vpack.c.bf16 %v412_v12, %v410_v11  ;;  %v881_v11 = vpack.c.bf16 %v497_v62, %v495_v61  ;;  %v494_v12 = vld [vmem:[#allocation5 + $0x2a0] sm:$0xff] }
  0x36   :  { %77 = vmax.xlane.f32.xlu0 %v76_v15  ;;  %v481_v15 = vld [vmem:[#allocation5 + $0x238] sm:$0xff] }
  0x37   :  { %v865_v18 = vpack.c.bf16 %v481_v15, %v479_v13  ;;  %v496_v13 = vld [vmem:[#allocation5 + $0x2b0] sm:$0xff]  ;;  %v817_v15 = vpack.c.bf16 %v433_v3, %v431_v63 }
  0xb6   :  { %v62_v23 = vpop.xlane.xlu1 %61 }
  0xb7   :  { %v56_v24 = vpop.xlane.xlu0 %55  ;;  %v68_v33 = vmul.f32 0.00390625, %v62_v23  ;;  %v801_v23 = vpack.c.bf16 %v417_v21, %v415_v20  ;;  %v437_v20 = vld [vmem:[#allocation5 + $0xd8] sm:$0xff]  ;;  %v883_v21 = vpack.c.bf16 %v496_v13, %v494_v12  ;;  %v447_v12 = vld [vmem:[#allocation5 + $0x128] sm:$0xff] }
  0xb8   :  { %v66_v34 = vmul.f32 0.00390625, %v56_v24  ;;  %v416_v24 = vld [vmem:[#allocation5 + $0x30] sm:$0xff]  ;;  %v449_v13 = vld [vmem:[#allocation5 + $0x138] sm:$0xff] }
  0xb9   :  { %v102_v39 = vrot.slane %v68_v33, %v90_v32  ;;  %v421_v33 = vld [vmem:[#allocation5 + $0x58] sm:$0xff] }
  0xba   :  { %v65_v27 = vpop.xlane.xlu1 %64  ;;  %v91_v40 = vrot.slane %v66_v34, %v90_v32  ;;  %v418_v34 = vld [vmem:[#allocation5 + $0x40] sm:$0xff] }
  0xbb   :  { %v59_v28 = vpop.xlane.xlu0 %58  ;;  %v69_v30 = vmul.f32 0.00390625, %v65_v27  ;;  %v485_v27 = vld [vmem:[#allocation5 + $0x258] sm:$0xff] }
  0xbc   :  { %v67_v31 = vmul.f32 0.00390625, %v59_v28  ;;  %v803_v28 = vpack.c.bf16 %v416_v24, %v414_v22  ;;  %v498_v24 = vld [vmem:[#allocation5 + $0x2c0] sm:$0xff] }
  0xbd   :  { %v106_v37 = vrot.slane %v69_v30, %v95_v29  ;;  %v482_v30 = vld [vmem:[#allocation5 + $0x240] sm:$0xff] }
  0xbe   :  { %v75_v35 = vpop.xlane.xlu1 %74  ;;  %v96_v38 = vrot.slane %v67_v31, %v95_v29  ;;  %v484_v31 = vld [vmem:[#allocation5 + $0x250] sm:$0xff] }
  0xbf   :  { %v72_v36 = vpop.xlane.xlu0 %71  ;;  %v122_v41 = vrot.slane %v75_v35, %v95_v29  ;;  %v107_v46 = vsel %vm97_vm1, %v106_v37, %v102_v39  ;;  %v420_v35 = vld [vmem:[#allocation5 + $0x50] sm:$0xff]  ;;  %v489_v39 = vld [vmem:[#allocation5 + $0x278] sm:$0xff] }
  0xc0   :  { %v118_v42 = vrot.slane %v72_v36, %v90_v32  ;;  %v98_v47 = vsel %vm97_vm1, %v96_v38, %v91_v40  ;;  %v871_v36 = vpack.c.bf16 %v484_v31, %v482_v30  ;;  %v487_v38 = vld [vmem:[#allocation5 + $0x268] sm:$0xff]  ;;  %v486_v40 = vld [vmem:[#allocation5 + $0x260] sm:$0xff]  ;;  %v505_v31 = vld [vmem:[#allocation5 + $0x2f8] sm:$0xff] }
  0xc1   :  { %v109_v51 = vsel %vm108_vm2, %v107_v46, %v98_v47  ;;  %v422_v47 = vld [vmem:[#allocation5 + $0x60] sm:$0xff]  ;;  %v503_v30 = vld [vmem:[#allocation5 + $0x2e8] sm:$0xff] }
  0xc2   :  { %v81_v43 = vpop.xlane.xlu1 %80  ;;  %v123_v49 = vsel %vm97_vm1, %v122_v41, %v118_v42  ;;  %v807_v41 = vpack.c.bf16 %v420_v35, %v418_v34  ;;  %v873_v42 = vpack.c.bf16 %v489_v39, %v487_v38  ;;  %v504_v38 = vld [vmem:[#allocation5 + $0x2f0] sm:$0xff]  ;;  %v438_v39 = vld [vmem:[#allocation5 + $0xe0] sm:$0xff] }
  0xc3   :  { %v131_v44 = vrot.slane %v81_v43, %v95_v29  ;;  %v78_v45 = vpop.xlane.xlu0 %77  ;;  %v869_v29 = vpack.c.bf16 %v485_v27, %v483_v25  ;;  %v488_v43 = vld [vmem:[#allocation5 + $0x270] sm:$0xff]  ;;  %v434_v27 = vld [vmem:[#allocation5 + $0xc0] sm:$0xff] }
  0xc4   :  { %v127_v48 = vrot.slane %v78_v45, %v90_v32  ;;  %v419_v32 = vld [vmem:[#allocation5 + $0x48] sm:$0xff]  ;;  %v425_v45 = vld [vmem:[#allocation5 + $0x78] sm:$0xff]  ;;  %v500_v25 = vld [vmem:[#allocation5 + $0x2d0] sm:$0xff] }
  0xc5   :  { %v805_v37 = vpack.c.bf16 %v421_v33, %v419_v32  ;;  %v439_v32 = vld [vmem:[#allocation5 + $0xe8] sm:$0xff]  ;;  %v441_v33 = vld [vmem:[#allocation5 + $0xf8] sm:$0xff]  ;;  %v887_v34 = vpack.c.bf16 %v500_v25, %v498_v24 }
  0xc6   :  { %v132_v50 = vsel %vm97_vm1, %v131_v44, %v127_v48  ;;  %v423_v44 = vld [vmem:[#allocation5 + $0x68] sm:$0xff]  ;;  %v424_v48 = vld [vmem:[#allocation5 + $0x70] sm:$0xff] }
  0xc7   :  { %v134_v52 = vsel %vm133_vm3, %v132_v50, %v123_v49  ;;  %v809_v46 = vpack.c.bf16 %v425_v45, %v423_v44  ;;  %v491_v49 = vld [vmem:[#allocation5 + $0x288] sm:$0xff]  ;;  %v493_v50 = vld [vmem:[#allocation5 + $0x298] sm:$0xff]  ;;  %v811_v54 = vpack.c.bf16 %v424_v48, %v422_v47 }
  0xc8   :  { %v137_v53 = vsel %vm136_vm4, %v109_v51, %v134_v52  ;;  %v875_v51 = vpack.c.bf16 %v488_v43, %v486_v40  ;;  %v427_v52 = vld [vmem:[#allocation5 + $0x88] sm:$0xff]  ;;  %v825_v40 = vpack.c.bf16 %v441_v33, %v439_v32  ;;  %v509_v43 = vld [vmem:[#allocation5 + $0x318] sm:$0xff] }
  0xc9   :  { %787 = vmatmul.mubr.msk.f32.vlgmr.msra.gmra.mrb[0].mxu0 %vm140_vm5, %v137_v53  ;;  %v429_v53 = vld [vmem:[#allocation5 + $0x98] sm:$0xff]  ;;  %v443_v44 = vld [vmem:[#allocation5 + $0x108] sm:$0xff] }
  0xca   :  { %800 = vmatpush1.bf16.msra.mxu0 %v799_v14  ;;  %v813_v59 = vpack.c.bf16 %v429_v53, %v427_v52  ;;  %v430_v14 = vld [vmem:[#allocation5 + $0xa0] sm:$0xff]  ;;  %v445_v45 = vld [vmem:[#allocation5 + $0x118] sm:$0xff]  ;;  %v444_v53 = vld [vmem:[#allocation5 + $0x110] sm:$0xff] }
  0xcb   :  { %802 = vmatprep.subr.bf16.mxu0 %v801_v23  ;;  %v819_v22 = vpack.c.bf16 %v432_v16, %v430_v14  ;;  %v829_v52 = vpack.c.bf16 %v445_v45, %v443_v44  ;;  %v446_v16 = vld [vmem:[#allocation5 + $0x120] sm:$0xff]  ;;  %v451_v25 = vld [vmem:[#allocation5 + $0x148] sm:$0xff]  ;;  %v521_v33 = vld [vmem:[#allocation5 + $0x378] sm:$0xff] }
  0xcc   :  { %v519_v32 = vld [vmem:[#allocation5 + $0x368] sm:$0xff] }
  0xcd   :  { %v523_v45 = vld [vmem:[#allocation5 + $0x388] sm:$0xff] }
  0xce   :  { %804 = vmatpush1.bf16.msra.mxu0 %v803_v28 }
  0xcf   :  { %806 = vmatprep.subr.bf16.mxu0 %v805_v37  ;;  %v502_v37 = vld [vmem:[#allocation5 + $0x2e0] sm:$0xff] }
  0xd2   :  { %808 = vmatpush1.bf16.msra.mxu0 %v807_v41  ;;  %v440_v41 = vld [vmem:[#allocation5 + $0xf0] sm:$0xff] }
  0xd3   :  { %810 = vmatprep.subr.bf16.mxu0 %v809_v46  ;;  %v891_v46 = vpack.c.bf16 %v504_v38, %v502_v37  ;;  %v827_v47 = vpack.c.bf16 %v440_v41, %v438_v39  ;;  %v455_v38 = vld [vmem:[#allocation5 + $0x168] sm:$0xff]  ;;  %v457_v39 = vld [vmem:[#allocation5 + $0x178] sm:$0xff] }
  0xd4   :  { %v841_v41 = vpack.c.bf16 %v457_v39, %v455_v38  ;;  %v470_v38 = vld [vmem:[#allocation5 + $0x1e0] sm:$0xff] }
  0xd6   :  { %812 = vmatpush1.bf16.msra.mxu0 %v811_v54  ;;  %v511_v54 = vld [vmem:[#allocation5 + $0x328] sm:$0xff] }
  0xd7   :  { %814 = vmatprep.subr.bf16.mxu0 %v813_v59  ;;  %v510_v59 = vld [vmem:[#allocation5 + $0x320] sm:$0xff] }
  0xd8   :  { %v899_v61 = vpack.c.bf16 %v512_v60, %v510_v59  ;;  %v527_v60 = vld [vmem:[#allocation5 + $0x3a8] sm:$0xff] }
  0xda   :  { %816 = vmatpush1.bf16.msra.mxu0 %v815_v10 }
  0xdb   :  { %818 = vmatprep.subr.bf16.mxu0 %v817_v15  ;;  %v833_v15 = vpack.c.bf16 %v449_v13, %v447_v12 }
  0xde   :  { %820 = vmatpush1.bf16.msra.mxu0 %v819_v22  ;;  %v514_v22 = vld [vmem:[#allocation5 + $0x340] sm:$0xff] }
 0x19c   :  { %v210_v55 = vpop.f32.mrb[0].mxu0 }
 0x19d   :  { %v214_v56 = vmax.f32 %v210_v55, 0.0  ;;  %v788_v57 = vpop.f32.mrb[1].mxu0  ;;  %v877_v55 = vpack.c.bf16 %v493_v50, %v491_v49  ;;  %v506_v49 = vld [vmem:[#allocation5 + $0x300] sm:$0xff]  ;;  %v508_v50 = vld [vmem:[#allocation5 + $0x310] sm:$0xff] }
 0x19e   :  { %v492_v57 = vld [vmem:[#allocation5 + $0x290] sm:$0xff] }
 0x19f   :  { %792 = vmatmul.mubr.msk.f32.vlgmr.msra.gmra.mrb[0].mxu1 %vm216_vm6, %v214_v56  ;;  %v490_v56 = vld [vmem:[#allocation5 + $0x280] sm:$0xff] }
 0x1a0   :  { %864 = vmatpush1.bf16.msra.mxu1 %v863_v7  ;;  %v879_v7 = vpack.c.bf16 %v492_v57, %v490_v56  ;;  %v895_v56 = vpack.c.bf16 %v508_v50, %v506_v49  ;;  %v524_v49 = vld [vmem:[#allocation5 + $0x390] sm:$0xff] }
 0x1a1   :  { %866 = vmatprep.subr.bf16.mxu1 %v865_v18  ;;  %v501_v18 = vld [vmem:[#allocation5 + $0x2d8] sm:$0xff] }
 0x1a2   :  { %v885_v23 = vpack.c.bf16 %v501_v18, %v499_v17  ;;  %v448_v17 = vld [vmem:[#allocation5 + $0x130] sm:$0xff] }
 0x1a3   :  { %v835_v18 = vpack.c.bf16 %v448_v17, %v446_v16  ;;  %v531_v17 = vld [vmem:[#allocation5 + $0x3c8] sm:$0xff] }
 0x1a4   :  { %868 = vmatpush1.bf16.msra.mxu1 %v867_v19  ;;  %v435_v19 = vld [vmem:[#allocation5 + $0xc8] sm:$0xff] }
 0x1a5   :  { %870 = vmatprep.subr.bf16.mxu1 %v869_v29  ;;  %v821_v28 = vpack.c.bf16 %v437_v20, %v435_v19  ;;  %v436_v29 = vld [vmem:[#allocation5 + $0xd0] sm:$0xff]  ;;  %v515_v19 = vld [vmem:[#allocation5 + $0x348] sm:$0xff]  ;;  %v517_v20 = vld [vmem:[#allocation5 + $0x358] sm:$0xff] }
 0x1a6   :  { %v823_v35 = vpack.c.bf16 %v436_v29, %v434_v27  ;;  %v453_v27 = vld [vmem:[#allocation5 + $0x158] sm:$0xff]  ;;  %v450_v29 = vld [vmem:[#allocation5 + $0x140] sm:$0xff] }
 0x1a7   :  { %822 = vmatprep.subr.bf16.mxu0 %v821_v28  ;;  %v837_v28 = vpack.c.bf16 %v453_v27, %v451_v25  ;;  %v466_v27 = vld [vmem:[#allocation5 + $0x1c0] sm:$0xff] }
 0x1a8   :  { %872 = vmatpush1.bf16.msra.mxu1 %v871_v36  ;;  %v889_v36 = vpack.c.bf16 %v505_v31, %v503_v30  ;;  %824 = vmatpush1.bf16.msra.mxu0 %v823_v35  ;;  %v452_v30 = vld [vmem:[#allocation5 + $0x150] sm:$0xff]  ;;  %v518_v35 = vld [vmem:[#allocation5 + $0x360] sm:$0xff] }
 0x1a9   :  { %874 = vmatprep.subr.bf16.mxu1 %v873_v42  ;;  %v507_v42 = vld [vmem:[#allocation5 + $0x308] sm:$0xff]  ;;  %826 = vmatprep.subr.bf16.mxu0 %v825_v40  ;;  %v839_v31 = vpack.c.bf16 %v452_v30, %v450_v29  ;;  %v1131_v40 = vsub.s32 0, %v1122_v26 }
 0x1aa   :  { %v893_v48 = vpack.c.bf16 %v509_v43, %v507_v42  ;;  %v454_v42 = vld [vmem:[#allocation5 + $0x160] sm:$0xff]  ;;  %v456_v43 = vld [vmem:[#allocation5 + $0x170] sm:$0xff]  ;;  %v535_v29 = vld [vmem:[#allocation5 + $0x3e8] sm:$0xff] }
 0x1ab   :  { %v843_v44 = vpack.c.bf16 %v456_v43, %v454_v42 }
 0x1ac   :  { %876 = vmatpush1.bf16.msra.mxu1 %v875_v51  ;;  %v442_v51 = vld [vmem:[#allocation5 + $0x100] sm:$0xff]  ;;  %828 = vmatpush1.bf16.msra.mxu0 %v827_v47 }
 0x1ad   :  { %878 = vmatprep.subr.bf16.mxu1 %v877_v55  ;;  %v513_v55 = vld [vmem:[#allocation5 + $0x338] sm:$0xff]  ;;  %v831_v57 = vpack.c.bf16 %v444_v53, %v442_v51  ;;  %830 = vmatprep.subr.bf16.mxu0 %v829_v52  ;;  %v459_v52 = vld [vmem:[#allocation5 + $0x188] sm:$0xff] }
 0x1ae   :  { %v897_v58 = vpack.c.bf16 %v513_v55, %v511_v54  ;;  %v461_v53 = vld [vmem:[#allocation5 + $0x198] sm:$0xff]  ;;  %v1135_v55 = vsub.s32 1, %v1122_v26 }
 0x1b0   :  { %880 = vmatpush1.bf16.msra.mxu1 %v879_v7  ;;  %832 = vmatpush1.bf16.msra.mxu0 %v831_v57  ;;  %v458_v57 = vld [vmem:[#allocation5 + $0x180] sm:$0xff] }
 0x1b1   :  { %882 = vmatprep.subr.bf16.mxu1 %v881_v11  ;;  %834 = vmatprep.subr.bf16.mxu0 %v833_v15  ;;  %v464_v15 = vld [vmem:[#allocation5 + $0x1b0] sm:$0xff] }
 0x1b4   :  { %884 = vmatpush1.bf16.msra.mxu1 %v883_v21  ;;  %v901_v21 = vpack.c.bf16 %v517_v20, %v515_v19  ;;  %836 = vmatpush1.bf16.msra.mxu0 %v835_v18  ;;  %v533_v18 = vld [vmem:[#allocation5 + $0x3d8] sm:$0xff]  ;;  %v530_v20 = vld [vmem:[#allocation5 + $0x3c0] sm:$0xff] }
 0x1b5   :  { %886 = vmatprep.subr.bf16.mxu1 %v885_v23  ;;  %v516_v23 = vld [vmem:[#allocation5 + $0x350] sm:$0xff]  ;;  %838 = vmatprep.subr.bf16.mxu0 %v837_v28  ;;  %v917_v19 = vpack.c.bf16 %v533_v18, %v531_v17 }
 0x1b6   :  { %v903_v24 = vpack.c.bf16 %v516_v23, %v514_v22  ;;  %v467_v23 = vld [vmem:[#allocation5 + $0x1c8] sm:$0xff]  ;;  %v468_v28 = vld [vmem:[#allocation5 + $0x1d0] sm:$0xff] }
 0x1b7   :  { %v855_v30 = vpack.c.bf16 %v468_v28, %v466_v27 }
 0x1b8   :  { %888 = vmatpush1.bf16.msra.mxu1 %v887_v34  ;;  %v905_v34 = vpack.c.bf16 %v521_v33, %v519_v32  ;;  %840 = vmatpush1.bf16.msra.mxu0 %v839_v31  ;;  %v537_v31 = vld [vmem:[#allocation5 + $0x3f8] sm:$0xff]  ;;  %v534_v32 = vld [vmem:[#allocation5 + $0x3e0] sm:$0xff]  ;;  %v536_v33 = vld [vmem:[#allocation5 + $0x3f0] sm:$0xff] }
 0x1b9   :  { %890 = vmatprep.subr.bf16.mxu1 %v889_v36  ;;  %v520_v36 = vld [vmem:[#allocation5 + $0x370] sm:$0xff]  ;;  %842 = vmatprep.subr.bf16.mxu0 %v841_v41 }
 0x1ba   :  { %v907_v37 = vpack.c.bf16 %v520_v36, %v518_v35  ;;  %v923_v35 = vpack.c.bf16 %v536_v33, %v534_v32  ;;  %v471_v36 = vld [vmem:[#allocation5 + $0x1e8] sm:$0xff]  ;;  %v472_v41 = vld [vmem:[#allocation5 + $0x1f0] sm:$0xff] }
 0x1bb   :  { %v859_v42 = vpack.c.bf16 %v472_v41, %v470_v38 }
 0x1bc   :  { %892 = vmatpush1.bf16.msra.mxu1 %v891_v46  ;;  %v525_v46 = vld [vmem:[#allocation5 + $0x398] sm:$0xff]  ;;  %844 = vmatpush1.bf16.msra.mxu0 %v843_v44 }
 0x1bd   :  { %894 = vmatprep.subr.bf16.mxu1 %v893_v48  ;;  %v909_v47 = vpack.c.bf16 %v525_v46, %v523_v45  ;;  %v522_v48 = vld [vmem:[#allocation5 + $0x380] sm:$0xff] }
 0x1be   :  { %v911_v51 = vpack.c.bf16 %v524_v49, %v522_v48 }
 0x1c0   :  { %896 = vmatpush1.bf16.msra.mxu1 %v895_v56  ;;  %v845_v56 = vpack.c.bf16 %v461_v53, %v459_v52 }
 0x1c1   :  { %898 = vmatprep.subr.bf16.mxu1 %v897_v58  ;;  %v460_v58 = vld [vmem:[#allocation5 + $0x190] sm:$0xff] }
 0x1c2   :  { %v847_v59 = vpack.c.bf16 %v460_v58, %v458_v57  ;;  %846 = vmatprep.subr.bf16.mxu0 %v845_v56 }
 0x1c4   :  { %900 = vmatpush1.bf16.msra.mxu1 %v899_v61  ;;  %v529_v61 = vld [vmem:[#allocation5 + $0x3b8] sm:$0xff]  ;;  %848 = vmatpush1.bf16.msra.mxu0 %v847_v59 }
 0x1c5   :  { %902 = vmatprep.subr.bf16.mxu1 %v901_v21  ;;  %v532_v21 = vld [vmem:[#allocation5 + $0x3d0] sm:$0xff] }
 0x1c6   :  { %v919_v22 = vpack.c.bf16 %v532_v21, %v530_v20 }
 0x1c8   :  { %904 = vmatpush1.bf16.msra.mxu1 %v903_v24  ;;  %v469_v24 = vld [vmem:[#allocation5 + $0x1d8] sm:$0xff] }
 0x1c9   :  { %906 = vmatprep.subr.bf16.mxu1 %v905_v34  ;;  %v853_v25 = vpack.c.bf16 %v469_v24, %v467_v23  ;;  %v921_v34 = vpack.c.bf16 %v537_v31, %v535_v29 }
 0x1cc   :  { %908 = vmatpush1.bf16.msra.mxu1 %v907_v37  ;;  %v473_v37 = vld [vmem:[#allocation5 + $0x1f8] sm:$0xff] }
 0x1cd   :  { %910 = vmatprep.subr.bf16.mxu1 %v909_v47  ;;  %v857_v39 = vpack.c.bf16 %v473_v37, %v471_v36 }
 0x1d0   :  { %912 = vmatpush1.bf16.msra.mxu1 %v911_v51 }
 0x272   :  { %v289_v62 = vpop.f32.mrb[0].mxu1 }
 0x273   :  { %v294_v63 = vrot.slane %v289_v62, 2  ;;  %v793_v3 = vpop.f32.mrb[1].mxu1 }
 0x274   :  { %v528_v3 = vld [vmem:[#allocation5 + $0x3b0] sm:$0xff] }
 0x275   :  { %v296_v7 = vadd.f32 %v294_v63, %v289_v62  ;;  %v913_v62 = vpack.c.bf16 %v529_v61, %v527_v60  ;;  %v526_v63 = vld [vmem:[#allocation5 + $0x3a0] sm:$0xff] }
 0x277   :  { %v774_v10 = vmul.f32 -1.442695, %v296_v7  ;;  %v915_v7 = vpack.c.bf16 %v528_v3, %v526_v63  ;;  %914 = vmatprep.subr.bf16.mxu1 %v913_v62 }
 0x279   :  { %936 = vpow2.f32 %v774_v10  ;;  %v463_v10 = vld [vmem:[#allocation5 + $0x1a8] sm:$0xff]  ;;  %916 = vmatpush1.bf16.msra.mxu1 %v915_v7 }
 0x27a   :  { %918 = vmatprep.subr.bf16.mxu1 %v917_v19 }
 0x27d   :  { %920 = vmatpush1.bf16.msra.mxu1 %v919_v22 }
 0x27e   :  { %922 = vmatprep.subr.bf16.mxu1 %v921_v34 }
 0x281   :  { %924 = vmatpush1.bf16.msra.mxu1 %v923_v35 }
 0x283   :  { %v937_v11 = vpop.eup %936 }
 0x284   :  { %v300_v14 = vadd.f32 1.0, %v937_v11  ;;  %v465_v11 = vld [vmem:[#allocation5 + $0x1b8] sm:$0xff] }
 0x285   :  { %v849_v13 = vpack.c.bf16 %v465_v11, %v463_v10 }
 0x286   :  { %938 = vrcp.f32 %v300_v14  ;;  %v462_v14 = vld [vmem:[#allocation5 + $0x1a0] sm:$0xff] }
 0x287   :  { %v851_v16 = vpack.c.bf16 %v464_v15, %v462_v14  ;;  %850 = vmatprep.subr.bf16.mxu0 %v849_v13 }
 0x289   :  { %852 = vmatpush1.bf16.msra.mxu0 %v851_v16 }
 0x28a   :  { %854 = vmatprep.subr.bf16.mxu0 %v853_v25 }
 0x28d   :  { %856 = vmatpush1.bf16.msra.mxu0 %v855_v30 }
 0x28e   :  { %858 = vmatprep.subr.bf16.mxu0 %v857_v39 }
 0x290   :  { %v939_v50 = vpop.eup %938 }
 0x291   :  { %v306_v54 = vrot.slane %v939_v50, %v1131_v40  ;;  %v317_v12 = vrot.slane %v939_v50, %v1135_v55  ;;  %860 = vmatpush1.bf16.msra.mxu0 %v859_v42 }
 0x293   :  { %312 = vbcast.lane.b32.xlu1 %v306_v54, 264  ;;  %308 = vbcast.lane.b32.xlu0 %v306_v54, 256 }
 0x297   :  { %319 = vbcast.lane.b32.xlu1 %v317_v12, 256 }
 0x29b   :  { %323 = vbcast.lane.b32.xlu1 %v317_v12, 264 }
 0x305   :  { %v313_v43 = vpop.permute.xlu1 %312  ;;  %v309_v44 = vpop.permute.xlu0 %308 }
 0x306   :  { %v1139_v45 = vmul.f32 %v313_v43, %v1100_v8  ;;  %v1142_v46 = vmul.f32 %v313_v43, %v1102_v9  ;;  %v1145_v47 = vmul.f32 %v309_v44, %v1088_v2  ;;  %v1148_v48 = vmul.f32 %v309_v44, %v1092_v4 }
 0x308   :  { %v333_v49 = vadd.f32 %v1139_v45, %v1145_v47  ;;  %v340_v50 = vadd.f32 %v1142_v46, %v1148_v48  ;;  %v366_v51 = vmax.f32 %v1145_v47, %v1139_v45  ;;  %v373_v8 = vmax.f32 %v1148_v48, %v1142_v46 }
 0x309   :  { %v320_v9 = vpop.permute.xlu1 %319 }
 0x30a   :  { %v334_v52 = vrot.slane %v333_v49, 4  ;;  %v341_v53 = vrot.slane %v340_v50, 4  ;;  %v367_v2 = vrot.slane %v366_v51, 4  ;;  %v374_v54 = vrot.slane %v373_v8, 4 }
 0x30b   :  { %v1159_v62 = vmul.f32 %v320_v9, %v1084_v0  ;;  %v1162_v63 = vmul.f32 %v320_v9, %v1086_v1 }
 0x30c   :  { %v335_v56 = vadd.f32 %v334_v52, %v333_v49  ;;  %v342_v4 = vadd.f32 %v341_v53, %v340_v50  ;;  %v368_v57 = vmax.f32 %v366_v51, %v367_v2  ;;  %v375_v58 = vmax.f32 %v373_v8, %v374_v54 }
 0x30d   :  { %v324_v59 = vpop.permute.xlu1 %323 }
 0x30e   :  { %v336_v60 = vrot.slane %v335_v56, 2  ;;  %v343_v61 = vrot.slane %v342_v4, 2  ;;  %v1165_v3 = vmul.f32 %v324_v59, %v1094_v5  ;;  %v1168_v7 = vmul.f32 %v324_v59, %v1096_v6 }
 0x30f   :  { %v369_v10 = vrot.slane %v368_v57, 2  ;;  %v376_v11 = vrot.slane %v375_v58, 2 }
 0x310   :  { %v347_v12 = vadd.f32 %v1165_v3, %v1159_v62  ;;  %v354_v13 = vadd.f32 %v1168_v7, %v1162_v63  ;;  %v380_v0 = vmax.f32 %v1159_v62, %v1165_v3  ;;  %v387_v1 = vmax.f32 %v1162_v63, %v1168_v7 }
 0x311   :  { %v337_v14 = vadd.f32 %v336_v60, %v335_v56  ;;  %v344_v5 = vadd.f32 %v343_v61, %v342_v4  ;;  %v370_v18 = vmax.f32 %v368_v57, %v369_v10  ;;  %v377_v19 = vmax.f32 %v375_v58, %v376_v11 }
 0x312   :  { %v348_v15 = vrot.slane %v347_v12, 4  ;;  %v355_v16 = vrot.slane %v354_v13, 4  ;;  %v381_v6 = vrot.slane %v380_v0, 4  ;;  %v388_v17 = vrot.slane %v387_v1, 4 }
 0x313   :  { %v345_v24 = vrot.slane %v344_v5, 1  ;;  %v338_v25 = vrot.slane %v337_v14, 1  ;;  %v378_v31 = vrot.slane %v377_v19, 1  ;;  %v371_v32 = vrot.slane %v370_v18, 1 }
 0x314   :  { %v349_v20 = vadd.f32 %v348_v15, %v347_v12  ;;  %v356_v21 = vadd.f32 %v355_v16, %v354_v13  ;;  %v382_v22 = vmax.f32 %v380_v0, %v381_v6  ;;  %v389_v23 = vmax.f32 %v387_v1, %v388_v17 }
 0x315   :  { %v346_v37 = vadd.f32 %v345_v24, %v344_v5  ;;  %v339_v38 = vadd.f32 %v338_v25, %v337_v14  ;;  %v379_v44 = vmax.f32 %v377_v19, %v378_v31  ;;  %v372_v49 = vmax.f32 %v370_v18, %v371_v32 }
 0x316   :  { %v350_v27 = vrot.slane %v349_v20, 2  ;;  %v357_v28 = vrot.slane %v356_v21, 2  ;;  %v383_v29 = vrot.slane %v382_v22, 2  ;;  %v390_v30 = vrot.slane %v389_v23, 2 }
 0x317   :  { %v363_v52 = vmul.f32 0.0625, %v346_v37  ;;  %v362_v53 = vmul.f32 0.0625, %v339_v38  ;;  %v1027_v16 = vmov 1966171168  }
 0x318   :  { %v351_v33 = vadd.f32 %v350_v27, %v349_v20  ;;  %v384_v34 = vmax.f32 %v382_v22, %v383_v29  ;;  %v391_v35 = vmax.f32 %v389_v23, %v390_v30  ;;  %v358_v36 = vadd.f32 %v357_v28, %v356_v21 }
 0x319   :  { %v696_v6 = vunpack.c.l.s4 %v1027_v16 }
 0x31a   :  { %v392_v39 = vrot.slane %v391_v35, 1  ;;  %v385_v41 = vrot.slane %v384_v34, 1  ;;  %v359_v42 = vrot.slane %v358_v36, 1  ;;  %v352_v43 = vrot.slane %v351_v33, 1 }
 0x31b   :  { %v697_v17 = vunpack.c.0.s8 %v696_v6 }
 0x31c   :  { %v393_v50 = vmax.f32 %v391_v35, %v392_v39  ;;  %v386_v51 = vmax.f32 %v384_v34, %v385_v41  ;;  %v360_v8 = vadd.f32 %v359_v42, %v358_v36  ;;  %v353_v9 = vadd.f32 %v352_v43, %v351_v33 }
 0x31d   :  { %v700_v19 = vsub.s32 %v697_v17, %v1122_v26 }
 0x31e   :  { %v407_v2 = vsel %vm108_vm2, %v393_v50, %v379_v44  ;;  %v406_v54 = vsel %vm108_vm2, %v386_v51, %v372_v49  ;;  %v365_v56 = vmul.f32 0.0625, %v360_v8  ;;  %v364_v4 = vmul.f32 0.0625, %v353_v9 }
 0x31f   :  { %673 = vmatprep.mubr.f32.mxu1 %v407_v2 }
 0x320   :  { %674 = vmatmul.mubr.f32.vlgmr.msra.gmra.mrb[2].mxu1 %v406_v54  ;;  %v399_v57 = vsel %vm108_vm2, %v365_v56, %v363_v52  ;;  %v398_v58 = vsel %vm108_vm2, %v364_v4, %v362_v53 }
 0x321   :  { %602 = vmatprep.mubr.f32.mxu0 %v399_v57 }
 0x322   :  { %603 = vmatmul.mubr.f32.vlgmr.msra.gmra.mrb[2].mxu0 %v398_v58 }
 0x3f3   :  { %v675_v59 = vpop.f32.mrb[2].mxu1 }
 0x3f4   :  { %v677_v60 = vpop.f32.mrb[3].mxu1 }
 0x3f5   :  { %v604_v61 = vpop.f32.mrb[2].mxu0 }
 0x3f6   :  { %v676_v10 = vadd.f32 %v675_v59, %v604_v61  ;;  %v606_v11 = vpop.f32.mrb[3].mxu0 }
 0x3f7   :  { %v678_v12 = vadd.f32 %v677_v60, %v606_v11 }
 0x3f8   :  { %v775_v13 = vmul.f32 -1.442695, %v676_v10 }
 0x3f9   :  { %v776_v0 = vmul.f32 -1.442695, %v678_v12 }
 0x3fa   :  { %940 = vpow2.f32 %v775_v13 }
 0x3fb   :  { %942 = vpow2.f32 %v776_v0 }
 0x404   :  { %v941_v1 = vpop.eup %940 }
 0x405   :  { %v943_v14 = vpop.eup %942  ;;  %v686_v5 = vadd.f32 1.0, %v941_v1 }
 0x406   :  { %v687_v15 = vadd.f32 1.0, %v943_v14 }
 0x407   :  { %944 = vrcp.f32 %v686_v5 }
 0x408   :  { %946 = vrcp.f32 %v687_v15 }
 0x411   :  { %v945_v18 = vpop.eup %944 }
 0x412   :  { %v947_v20 = vpop.eup %946 }
 0x413   :  { %v694_v21 = vcombine.low %v945_v18, %v947_v20 }
 0x415   :  { %v701_v22 = vrot.slane %v694_v21, %v700_v19 }
 0x417   :  { %v702_v23 = vcombine.high %v701_v22, %v701_v22  ;;  %v709_v24 = vrot.slane %v701_v22, %v700_v19 }
 0x419   :  { %v716_v25 = vrot.slane %v702_v23, %v700_v19  ;;  %v720_v27 = vrot.slane %v709_v24, %v1131_v40  ;;  %v724_v28 = vrot.slane %v709_v24, %v1135_v55 }
 0x41b   :  { %v728_v29 = vrot.slane %v716_v25, %v1131_v40  ;;  %v732_v30 = vrot.slane %v716_v25, %v1135_v55  ;;  %v737_v31 = vmul.f32 %v720_v27, %v1145_v47  ;;  %v738_v26 = vmul.f32 %v724_v28, %v1148_v48 }
 0x41c   :  { %v739_v32 = vmul.f32 %v720_v27, %v1139_v45  ;;  %v740_v33 = vmul.f32 %v724_v28, %v1142_v46 }
 0x41d   :  { %v741_v34 = vmul.f32 %v728_v29, %v1159_v62  ;;  %v742_v35 = vmul.f32 %v732_v30, %v1162_v63  ;;  %v743_v36 = vmul.f32 %v728_v29, %v1165_v3  ;;  %v744_v37 = vmul.f32 %v732_v30, %v1168_v7  ;;  %745 = vst [vmem:[#allocation7] sm:$0xff] %v737_v31 }
 0x41e   :  { %746 = vst [vmem:[#allocation7 + $0x8] sm:$0xff] %v738_v26  ;;  %747 = vst [vmem:[#allocation7 + $0x10] sm:$0xff] %v739_v32 }
 0x41f   :  { %748 = vst [vmem:[#allocation7 + $0x18] sm:$0xff] %v740_v33  ;;  %749 = vst [vmem:[#allocation7 + $0x20] sm:$0xff] %v741_v34 }
 0x420   :  { %750 = vst [vmem:[#allocation7 + $0x28] sm:$0xff] %v742_v35  ;;  %751 = vst [vmem:[#allocation7 + $0x30] sm:$0xff] %v743_v36 }
 0x421   :  { %752 = vst [vmem:[#allocation7 + $0x38] sm:$0xff] %v744_v37 }
 0x422   :  { %1003 = shalt.err (!%p1000_p6)
}
 0x423   :  { %s1004_s22 = scalar_lea.hbm %s1214_s4, 1024 }
 0x424   :  { %p1005_p7 = scmp.ne.s32.totalorder %s1214_s4, %s1004_s22  ;;  %p1008_p8 = scmp.lt.u32.totalorder %s1004_s22, %s1214_s4 }
 0x426   :  { %p1010_p9 = pnand %p1008_p8, %p1005_p7 }
 0x428   :  { %1013 = shalt.err (!%p1010_p9)
}
 0x429   :  { %764 = dma.vmem_to_hbm [thread:$0]  %s759_s18, 1024, %s1214_s4, [#allocation4], %s1021_s25, %s1021_s25, %s1022_s26  }
 0x42a   :  { %1018 = dma.done.wait [#allocation4], 1024  }
 0x42b   :  { %1019 = vsyncadd [#allocation4], 4294966272 }
 0x42c   :  { %768 = vsyncpa [#allocation3], 1 }
 0x42d   :  { %769 = vsyncpa [#allocation6], 1 }
 0x42e   :  { %770 = vsyncpa [#allocation4], 1 }

</bundles_post_ra>
